<compile_context>
chip_gen: v5e
topology: v5e:2x2
jax: 0.10.0
libtpu: 0.0.40
codegen_flags: <defaults>
</compile_context>

<pallas_src>
import jax
import jax.numpy as jnp
from jax.experimental import pallas as pl
from jax.experimental.pallas import tpu as pltpu


# ---------------------------------------------------------------------------
# Fused kernel: single matmul (all three convs pre-folded) + bias + ReLU
# ---------------------------------------------------------------------------
def _spd_conv_kernel(x_ref, w_ref, b_ref, o_ref):
    x = x_ref[0]                                 # (4*c1, tm)  bf16, lanes = spatial
    w = w_ref[...]                               # (c2, 4*c1)  bf16, folded weight
    acc = jnp.dot(w, x, preferred_element_type=jnp.float32)   # (c2, tm) f32 on MXU
    y = acc + b_ref[...]                         # (c2, 1) f32 bias, lane-broadcast
    o_ref[0] = jnp.maximum(y, 0.0).astype(o_ref.dtype)        # ReLU, bf16 store


def _pick_spatial_tile(spatial, K, c2, n_batch):
    """Lane tile over the flattened h2*w2 axis.

    Big (amortize ~0.35 us per grid step), a multiple of 128 whenever it
    actually tiles (lane-dense loads/stores; Pallas masks the tail block),
    sized from a VMEM budget conservative enough for v7x's 64 MiB VMEM, and
    keeping >= 2 total grid steps when possible (v7x has 2 TensorCores).
    """
    per_col = 2 * 2 * (K + c2)      # double-buffered bf16 in+out bytes / lane column
    budget = 16 * 1024 * 1024
    cap = min(8192, max(128, (budget // per_col) // 128 * 128))
    if spatial > cap:
        return cap
    if n_batch == 1 and spatial >= 256:
        # split the only grid axis so both v7x TensorCores get work
        return -(-((spatial + 1) // 2) // 128) * 128
    return spatial


# ---------------------------------------------------------------------------
# SPD_Conv forward: Pallas path (NCHW in, NCHW out)
# ---------------------------------------------------------------------------
def spd_conv_forward_pallas(x_nchw, p):
    n, c1, h, w = x_nchw.shape
    assert h % 2 == 0 and w % 2 == 0, "SPD_Conv requires even spatial dims"
    h2, w2 = h // 2, w // 2
    S = h2 * w2                    # flattened output spatial extent (lane dim)
    K = 4 * c1                     # folded contraction dim
    c1r = p["rw"].shape[1]
    c2 = p["pw"].shape[1]

    # --- host-side EXACT fold (f32): reduction conv -> depthwise affine -> pointwise
    #   W_total[q*c1 + c, o] = sum_r rw[c, r] * dw_w[q*c1r + r] * pw[q*c1r + r, o]
    #   b_total[o]           = pb[o] + sum_q (rb * dw_w_q + dw_b_q) @ pw_q
    rw = p["rw"].astype(jnp.float32)
    rb = p["rb"].astype(jnp.float32)
    w_blocks = []
    b_total = p["pb"].astype(jnp.float32)
    for q in range(4):
        sl = slice(q * c1r, (q + 1) * c1r)
        dw_w_q = p["dw_w"][sl].astype(jnp.float32)
        dw_b_q = p["dw_b"][sl].astype(jnp.float32)
        pw_q = p["pw"][sl, :].astype(jnp.float32)
        w_blocks.append(rw @ (dw_w_q[:, None] * pw_q))           # (c1, c2)
        b_total = b_total + (rb * dw_w_q + dw_b_q) @ pw_q
    w_t = jnp.concatenate(w_blocks, axis=0).T.astype(jnp.bfloat16)   # (c2, 4*c1)
    b_t = b_total.reshape(c2, 1).astype(jnp.float32)

    # --- single fused input rearrange+cast pass:
    # NCHW -> (n, [dw, dh, c], [i, j]); channel index (dh + 2*dw)*c1 + c matches
    # the torch.cat block order, spatial index i*w2 + j matches the NCHW output.
    x6 = x_nchw.reshape(n, c1, h2, 2, w2, 2)             # zero-copy split of h, w
    x_t = (jnp.transpose(x6, (0, 5, 3, 1, 2, 4))         # one XLA transpose copy
           .reshape(n, K, S)
           .astype(jnp.bfloat16))                        # convert fuses into the copy

    tm = _pick_spatial_tile(S, K, c2, n)
    grid = (n, pl.cdiv(S, tm))

    blk_bytes = 2 * (K * tm * 2 + c2 * tm * 2) + 2 * (c2 * K * 2 + c2 * 4)
    vmem_limit = int(min(max(2 * blk_bytes + (4 << 20), 8 << 20), 32 << 20))

    out_t = pl.pallas_call(
        _spd_conv_kernel,
        grid=grid,
        in_specs=[
            pl.BlockSpec((1, K, tm), lambda b, s: (b, 0, s)),
            # Weight / bias are grid-invariant (constant index_map) and tiny here.
            # TODO(synk): for production channel counts, single-buffer them
            #             (pipeline_mode=pl.Buffered(1)) to save v7x VMEM headroom.
            pl.BlockSpec((c2, K), lambda b, s: (0, 0)),
            pl.BlockSpec((c2, 1), lambda b, s: (0, 0)),
        ],
        out_specs=pl.BlockSpec((1, c2, tm), lambda b, s: (b, 0, s)),
        out_shape=jax.ShapeDtypeStruct((n, c2, S), jnp.bfloat16),
        compiler_params=pltpu.CompilerParams(
            dimension_semantics=("parallel", "parallel"),
            vmem_limit_bytes=vmem_limit,
        ),
    )(x_t, w_t, b_t)

    # (n, c2, h2*w2) -> (n, c2, h2, w2): free reshape, already NCHW. bf16 output.
    return out_t.reshape(n, c2, h2, w2)


# ---------------------------------------------------------------------------
# Deterministic parameter init (inference-form conv weights + biases)
# ---------------------------------------------------------------------------
def init_params(key, c1, c2, reduction=1):
    c1r = c1 // reduction
    cin = 4 * c1r
    ks = jax.random.split(key, 6)
    return {
        "rw": 0.1 * jax.random.normal(ks[0], (c1, c1r), jnp.float32),        # reduction_conv (in, out)
        "rb": 0.1 * jax.random.normal(ks[1], (c1r,), jnp.float32),
        "dw_w": 1.0 + 0.1 * jax.random.normal(ks[2], (cin,), jnp.float32),   # 1x1 depthwise = per-channel scale
        "dw_b": 0.1 * jax.random.normal(ks[3], (cin,), jnp.float32),
        "pw": 0.1 * jax.random.normal(ks[4], (cin, c2), jnp.float32),        # pointwise (in, out)
        "pb": 0.1 * jax.random.normal(ks[5], (c2,), jnp.float32),
    }


# ---------------------------------------------------------------------------
# Pure-JAX f32 reference (follows the PyTorch module op-by-op)
# ---------------------------------------------------------------------------
def spd_conv_forward_ref(x_nchw, p):
    x = x_nchw.astype(jnp.float32)
    y = jnp.einsum("nchw,co->nohw", x, p["rw"]) + p["rb"][None, :, None, None]
    s = jnp.concatenate([y[..., ::2, ::2], y[..., 1::2, ::2],
                         y[..., ::2, 1::2], y[..., 1::2, 1::2]], axis=1)
    z = s * p["dw_w"][None, :, None, None] + p["dw_b"][None, :, None, None]
    o = jnp.einsum("nchw,co->nohw", z, p["pw"]) + p["pb"][None, :, None, None]
    return jnp.maximum(o, 0.0)                                   # ReLU


if __name__ == "__main__":
    key = jax.random.PRNGKey(0)
    kx, kp = jax.random.split(key)
    c1, c2 = 4, 8
    x = jax.random.normal(kx, (2, c1, 16, 16), jnp.float32)      # NCHW like PyTorch
    params = init_params(kp, c1, c2, reduction=1)

    fwd = jax.jit(spd_conv_forward_pallas)
    out = jax.block_until_ready(fwd(x, params))
    ref = jax.block_until_ready(spd_conv_forward_ref(x, params))

    assert out.shape == (2, c2, 8, 8), out.shape
    out_f32 = out.astype(jnp.float32)
    max_err = float(jnp.max(jnp.abs(out_f32 - ref)))
    assert jnp.allclose(out_f32, ref, atol=2e-2, rtol=2e-2), max_err
    print("KERNEL_OK")
</pallas_src>

<mosaic_0001>
module attributes {stable_mosaic.version = 11 : i64} {
  func.func @_spd_conv_kernel(%arg0: i32, %arg1: i32, %arg2: memref<1x16x64xbf16, #tpu.memory_space<vmem>>, %arg3: memref<8x16xbf16, #tpu.memory_space<vmem>>, %arg4: memref<8x1xf32, #tpu.memory_space<vmem>>, %arg5: memref<1x8x64xbf16, #tpu.memory_space<vmem>>) attributes {dimension_semantics = [#tpu.dimension_semantics<parallel>, #tpu.dimension_semantics<parallel>], iteration_bounds = array<i64: 2, 1>, scalar_prefetch = 0 : i64, scratch_operands = 0 : i64, tpu.core_type = #tpu.core_type<tc>, window_params = [{transform_indices = @transform_0, window_bounds = array<i64: 1, 16, 64>}, {pipeline_mode = #tpu.pipeline_mode<synchronous>, transform_indices = @transform_1, window_bounds = array<i64: 8, 16>}, {pipeline_mode = #tpu.pipeline_mode<synchronous>, transform_indices = @transform_2, window_bounds = array<i64: 8, 1>}, {transform_indices = @transform_3, window_bounds = array<i64: 1, 8, 64>}]} {
    %c0 = arith.constant 0 : index
    %c0_0 = arith.constant 0 : index
    %c0_1 = arith.constant 0 : index
    %0 = vector.load %arg2[%c0, %c0_0, %c0_1] : memref<1x16x64xbf16, #tpu.memory_space<vmem>>, vector<1x16x64xbf16>
    %1 = vector.shape_cast %0 : vector<1x16x64xbf16> to vector<16x64xbf16>
    %c0_2 = arith.constant 0 : index
    %c0_3 = arith.constant 0 : index
    %2 = vector.load %arg3[%c0_2, %c0_3] : memref<8x16xbf16, #tpu.memory_space<vmem>>, vector<8x16xbf16>
    %cst = arith.constant dense<0.000000e+00> : vector<8x64xf32>
    %3 = tpu.matmul %2, %1, %cst {dimension_numbers = #tpu.dot_dimension_numbers<[1], [0], [0], [1], [0, 0, 1, 1], [], []>} : vector<8x16xbf16>, vector<16x64xbf16>, vector<8x64xf32> -> vector<8x64xf32>
    %c0_4 = arith.constant 0 : index
    %c0_5 = arith.constant 0 : index
    %4 = vector.load %arg4[%c0_4, %c0_5] : memref<8x1xf32, #tpu.memory_space<vmem>>, vector<8x1xf32>
    %5 = vector.broadcast %4 : vector<8x1xf32> to vector<8x64xf32>
    %6 = arith.addf %3, %5 : vector<8x64xf32>
    %cst_6 = arith.constant 0.000000e+00 : f32
    %7 = vector.broadcast %cst_6 : f32 to vector<8x64xf32>
    %8 = arith.maximumf %6, %7 : vector<8x64xf32>
    %9 = arith.truncf %8 : vector<8x64xf32> to vector<8x64xbf16>
    %c0_7 = arith.constant 0 : index
    %c0_8 = arith.constant 0 : index
    %c0_9 = arith.constant 0 : index
    %10 = vector.load %arg5[%c0_7, %c0_8, %c0_9] : memref<1x8x64xbf16, #tpu.memory_space<vmem>>, vector<1x8x64xbf16>
    %11 = vector.shape_cast %10 : vector<1x8x64xbf16> to vector<8x64xbf16>
    %12 = vector.shape_cast %9 : vector<8x64xbf16> to vector<1x8x64xbf16>
    tpu.vector_store %arg5[%c0_7, %c0_8, %c0_9], %12 {strides = array<i32>} : memref<1x8x64xbf16, #tpu.memory_space<vmem>>, vector<1x8x64xbf16>,
    return
  }
  func.func @transform_0(%arg0: i32, %arg1: i32) -> (i32, i32, i32) {
    %c0_i32 = arith.constant 0 : i32
    %c0_i32_0 = arith.constant 0 : i32
    return %arg0, %c0_i32, %arg1 : i32, i32, i32
  }
  func.func @transform_1(%arg0: i32, %arg1: i32) -> (i32, i32) {
    %c0_i32 = arith.constant 0 : i32
    %c0_i32_0 = arith.constant 0 : i32
    %c0_i32_1 = arith.constant 0 : i32
    return %c0_i32, %c0_i32_0 : i32, i32
  }
  func.func @transform_2(%arg0: i32, %arg1: i32) -> (i32, i32) {
    %c0_i32 = arith.constant 0 : i32
    %c0_i32_0 = arith.constant 0 : i32
    %c0_i32_1 = arith.constant 0 : i32
    return %c0_i32, %c0_i32_0 : i32, i32
  }
  func.func @transform_3(%arg0: i32, %arg1: i32) -> (i32, i32, i32) {
    %c0_i32 = arith.constant 0 : i32
    %c0_i32_0 = arith.constant 0 : i32
    return %arg0, %c0_i32, %arg1 : i32, i32, i32
  }
}

</mosaic_0001>

<bundles_post_ra>
// kernel: spd_conv_forward_pallas.1
= control target key start
LH: loop header
LB: loop body
LE: loop exit
PB: predicated region body
PF: predicated region fallthrough
CT: control target
= control target key end

     0   :  { %s402_s12 = smov 0   ;;  %s404_s13 = smov 0   ;;  %s441_s0 = inlined_call_operand.vmem [shape: bf16[2,16,64], index: 0, kind: input, shape index: {}]   ;;  %s442_s1 = inlined_call_operand.vmem [shape: bf16[8,16], index: 1, kind: input, shape index: {}]   ;;  %s443_s2 = inlined_call_operand.vmem [shape: f32[8,1], index: 2, kind: input, shape index: {}]   ;;  %s444_s3 = inlined_call_operand.vmem [shape: bf16[2,8,64], index: 3, kind: output, shape index: {}]  }
   0x1   :  { %s406_s14 = smov 0  }
   0x2 LB: > { %s25_s15 = sadd.s32 1, %s375_s13  ;;  %p318_p0 = scmp.ge.s32.totalorder %s379_s14, 1  ;;  %s379_s14 = sphi %s406_s14, %s13_s14   ;;  %s375_s13 = sphi %s404_s13, %s446_s13   ;;  %s371_s12 = sphi %s402_s12, %s445_s12  }
   0x3   : > { %p27_p1 = scmp.ge.s32.totalorder %s25_s15, 2  ;;  %p156_p2 = scmp.lt.s32.totalorder %s379_s14, 3 }
   0x5   : > { %s448_s15 = smov (%p27_p1, %s25_s15), 0  ;;  %p157_p3 = pnand %p318_p0, %p156_p2 }
   0x6   : > { %p185_p4 = scmp.lt.s32.totalorder (!%p157_p3), %s371_s12, 1 }
   0x7   : > { %160 = sbr.rel (%p157_p3) target bundleno = 153 (0x99), region = 32 }
   0xc   : > { %v204_v0 = vld [vmem:[%s443_s2] sm:$0xff]  ;;  %v381_v1 = vmov 0   ;;  %s450_s12 = smov (!%p185_p4, %s371_s12), 1  ;;  %vm216_vm0 = vcmask 130048   ;;  %vm235_vm1 = vcmask 519168  }
   0xd   : > { %356 = vset.pattern.permute.xlu0 %v381_v1  ;;  %s329_s18 = sshll.u32 %s450_s12, 3  ;;  %v203_v3 = vld [vmem:[%s442_s1] sm:$0xf]  ;;  %s321_s24 = sshll.u32 %s450_s12, 2 }
   0xe   : > { %207 = vperm.xlu0 %356, %v204_v0   ;;  %s192_s21 = scalar_lea.vmem %s441_s0, %s329_s18  ;;  %s199_s27 = scalar_lea.vmem %s444_s3, %s321_s24 }
   0xf   : > { %v330_v2 = vld [vmem:[%s192_s21] sm:$0xff] }
  0x10   : > { %227 = vmatpush.bf16.msra.mxu0 %v330_v2 }
  0x13   : > { %326 = vmatmul.msk.bf16.vlgmr.msra.gmra.mxu0 %vm216_vm0, %v203_v3 }
  0x80   : > { %v208_v4 = vpop.permute.xlu0 %207 }
  0x90   : > { %v229_v5 = vpop.f32.mrf.mxu0 }
  0x91   : > { %v230_v6 = vadd.f32 %v229_v5, %v208_v4 }
  0x93   : > { %v233_v7 = vmax.f32 %v230_v6, 0.0 }
  0x95   : > { %v234_v8 = vpack.c.bf16 %v233_v7, %v233_v7 }
  0x97   : > { %236 = vst.msk [vmem:[%s199_s27] sm:$0xf] %vm235_vm1, %v234_v8 }
  0x98   : > { %v231_v9 = vpop.f32.mrf.mxu0 }
  0x99 PF: > { %s13_s14 = sadd.s32 1, %s379_s14   ;;  %s445_s12 = smov %s375_s13 }
  0x9a   : > { %p10_p5 = scmp.ge.s32.totalorder %s13_s14, 4   ;;  %s446_s13 = smov %s448_s15 }
  0x9c   :  { %12 = sbr.rel (!%p10_p5) target bundleno = 2 (0x2), region = 62 }

</bundles_post_ra>
